<compile_context>
chip_gen: v5e
topology: v5e:2x2
jax: 0.10.0
libtpu: 0.0.40
codegen_flags: <defaults>
</compile_context>

<pallas_src>
import functools

import jax
import jax.numpy as jnp
from jax import lax
from jax.experimental import pallas as pl
from jax.experimental.pallas import tpu as pltpu


def _mean_all(x):
    # full mean of a 2D tile, kept as (1, 1) so it stays a plain vreg value
    return jnp.mean(jnp.mean(x, axis=1, keepdims=True), axis=0, keepdims=True)


def _sum_all(x):
    return jnp.sum(jnp.sum(x, axis=1, keepdims=True), axis=0, keepdims=True)


def _dot(a, b):
    # a @ b
    return lax.dot_general(a, b, (((1,), (0,)), ((), ())),
                           preferred_element_type=jnp.float32)


def _dot_t(a, b):
    # a @ b.T  (contract last dims of both; MXU takes either orientation)
    return lax.dot_general(a, b, (((1,), (1,)), ((), ())),
                           preferred_element_type=jnp.float32)


def _layer_loss_kernel(fv_ref, bases_ref, betas_ref, pred_ref, tgt_ref, out_ref,
                       *, inv_two_sigma_sq, lambda_OLS, lambda_orth,
                       lambda_sparse, orthogonal_loss, sparse_coding,
                       power_iters):
    fv = fv_ref[...]          # (B, Dp)
    bases = bases_ref[...]    # (MN, Dp)
    betas = betas_ref[...]    # (B, M)
    pred = pred_ref[...]      # (B, C)
    tgt = tgt_ref[...]        # (B, C)

    M = betas.shape[1]
    MN = bases.shape[0]
    N = MN // M
    c = inv_two_sigma_sq      # -1 / (2 * sigma**2)

    # ---- in-kernel averaging matrix A[m, k] = (m*N <= k < (m+1)*N) / N -----
    row_m = lax.broadcasted_iota(jnp.int32, (M, MN), 0)
    col_k = lax.broadcasted_iota(jnp.int32, (M, MN), 1)
    in_gdu = (col_k >= row_m * N) & (col_k < (row_m + 1) * N)
    A = jnp.where(in_gdu, jnp.float32(1.0 / N), jnp.float32(0.0))   # (M, MN)

    # ---- base criterion (MSE) ----------------------------------------------
    diff = pred - tgt
    base = _mean_all(diff * diff)

    # ---- Gram of all basis vectors; squared norms from its diagonal --------
    gram = _dot_t(bases, bases)                                     # (MN, MN)
    di = lax.broadcasted_iota(jnp.int32, (MN, MN), 0)
    dj = lax.broadcasted_iota(jnp.int32, (MN, MN), 1)
    gram_diag = jnp.where(di == dj, gram, jnp.float32(0.0))
    vsq_row = jnp.sum(gram_diag, axis=0, keepdims=True)             # (1, MN)
    vsq_col = jnp.sum(gram_diag, axis=1, keepdims=True)             # (MN, 1)

    # ---- k_x_V: RBF kernel feature vectors <-> basis vectors ---------------
    xv = _dot_t(fv, bases)                                          # (B, MN)
    xsq = jnp.sum(fv * fv, axis=1, keepdims=True)                   # (B, 1)
    d2_xv = jnp.maximum(xsq + vsq_row - 2.0 * xv, 0.0)
    k_full = jnp.exp(d2_xv * c)                                     # (B, MN)
    k_x_V = _dot_t(k_full, A)                                       # (B, M)

    # ---- OLS term 2 ---------------------------------------------------------
    t2 = _mean_all(-2.0 * jnp.sum(betas * k_x_V, axis=1, keepdims=True))

    # ---- K[m1, m2]: mean pairwise RBF between GDU basis sets ---------------
    d2_vv = jnp.maximum(vsq_col + vsq_row - 2.0 * gram, 0.0)
    k_vv = jnp.exp(d2_vv * c)                                       # (MN, MN)
    K = _dot_t(_dot(A, k_vv), A)                                    # (M, M), symmetric

    # ---- OLS term 3 ---------------------------------------------------------
    bK = _dot(betas, K)                                             # (B, M)
    t3 = _mean_all(jnp.sum(bK * betas, axis=1, keepdims=True))

    # ols_term_1 == rbf(x, x).mean() == exp(0) == 1 exactly
    loss = base + lambda_OLS * (1.0 + t2 + t3)

    # ---- orthogonal loss: spectral norm of K with zeroed diagonal ----------
    if orthogonal_loss:
        mi = lax.broadcasted_iota(jnp.int32, (M, M), 0)
        mj = lax.broadcasted_iota(jnp.int32, (M, M), 1)
        K_off = jnp.where(mi == mj, jnp.float32(0.0), K)            # symmetric
        B2 = _dot(K_off, K_off)                                     # symmetric PSD
        # normalized repeated squaring: P ∝ B2^(2^power_iters) -> dominant projector
        P = B2
        for _ in range(power_iters):
            P = _dot(P, P)
            P = P * lax.rsqrt(_sum_all(P * P) + 1e-30)
        # Rayleigh quotient with v = P @ ones (P symmetric, so row/col sums agree)
        v_col = jnp.sum(P, axis=1, keepdims=True)                   # (M, 1)
        v_row = jnp.sum(P, axis=0, keepdims=True)                   # (1, M)
        num = _sum_all(B2 * v_col * v_row)                          # v^T B2 v
        den = jnp.sum(v_col * v_col, axis=0, keepdims=True)         # v^T v
        s0 = jnp.sqrt(jnp.maximum(num, 0.0) / jnp.maximum(den, 1e-30))
        loss = loss + lambda_orth * s0

    # ---- sparse coding term --------------------------------------------------
    if sparse_coding:
        sparse = _mean_all(jnp.sum(jnp.abs(betas), axis=1, keepdims=True))
        loss = loss + lambda_sparse * sparse

    out_ref[...] = loss


def layer_loss_pallas(fv, domain_bases, betas, pred, tgt, *, sigma,
                      lambda_OLS, lambda_orth, lambda_sparse,
                      orthogonal_loss=True, sparse_coding=True):
    """domain_bases: (M, 1, D, N), mirroring the per-GDU PyTorch parameter (1, D, N)."""
    M, _, D, N = domain_bases.shape
    # flatten per-GDU bases (1, D, N) -> rows (M*N, D); row m*N + n = basis n of GDU m
    bases_flat = jnp.transpose(domain_bases[:, 0], (0, 2, 1)).reshape(M * N, D)

    # zero-pad feature dim to a lane multiple; squared distances are unchanged
    if D % 128 != 0:
        pad = 128 - D % 128
        fv = jnp.pad(fv, ((0, 0), (0, pad)))
        bases_flat = jnp.pad(bases_flat, ((0, 0), (0, pad)))

    kernel = functools.partial(
        _layer_loss_kernel,
        inv_two_sigma_sq=-1.0 / (2.0 * float(sigma) ** 2),
        lambda_OLS=float(lambda_OLS),
        lambda_orth=float(lambda_orth),
        lambda_sparse=float(lambda_sparse),
        orthogonal_loss=bool(orthogonal_loss),
        sparse_coding=bool(sparse_coding),
        power_iters=6)

    vmem = pl.BlockSpec(memory_space=pltpu.MemorySpace.VMEM)
    loss = pl.pallas_call(
        kernel,
        out_shape=jax.ShapeDtypeStruct((1, 1), jnp.float32),
        in_specs=[vmem] * 5,
        out_specs=vmem,
    )(fv, bases_flat, betas, pred, tgt)
    return loss[0, 0]


# ---------------------- pure-JAX reference (mirrors the torch code) -----------
def _rbf_ref(x, y, sigma):
    return jnp.exp(jnp.sum(jnp.square(x - y), axis=1) * (-1.0 / (2.0 * sigma ** 2)))


def layer_loss_ref(fv, domain_bases, betas, pred, tgt, *, sigma, lambda_OLS,
                   lambda_orth, lambda_sparse, orthogonal_loss=True,
                   sparse_coding=True):
    M = domain_bases.shape[0]
    base_loss = jnp.mean(jnp.square(pred - tgt))
    fvu = fv[:, :, None]                                        # (B, D, 1)
    t1 = jnp.mean(_rbf_ref(fvu, fvu, sigma))
    kxV = jnp.stack([jnp.mean(_rbf_ref(fvu, domain_bases[m], sigma), axis=1)
                     for m in range(M)], axis=1)                # (B, M)
    t2 = jnp.mean(-2.0 * jnp.sum(betas * kxV, axis=1))
    K = jnp.zeros((M, M), jnp.float32)
    for m1 in range(M):
        for m2 in range(M):
            K = K.at[m1, m2].set(jnp.mean(_rbf_ref(
                jnp.transpose(domain_bases[m1], (2, 1, 0)), domain_bases[m2], sigma)))
    t3 = jnp.mean(jnp.einsum('bm,mn,bn->b', betas, K, betas))
    loss = base_loss + lambda_OLS * (t1 + t2 + t3)
    if orthogonal_loss:
        s = jnp.linalg.svd(K - jnp.diag(jnp.diag(K)), compute_uv=False)
        loss = loss + lambda_orth * s[0]
    if sparse_coding:
        loss = loss + lambda_sparse * jnp.mean(jnp.sum(jnp.abs(betas), axis=1))
    return loss


if __name__ == "__main__":
    B, D, M, N, C = 8, 32, 4, 8, 4        # batch, feature dim, num GDUs, basis size, out dim
    hparams = dict(sigma=2.0, lambda_OLS=1.0, lambda_orth=0.1, lambda_sparse=0.01,
                   orthogonal_loss=True, sparse_coding=True)

    key = jax.random.PRNGKey(0)
    k1, k2, k3, k4, k5 = jax.random.split(key, 5)
    fv = 0.5 * jax.random.normal(k1, (B, D), jnp.float32)            # model.x_tilde
    domain_bases = 0.5 * jax.random.normal(k2, (M, 1, D, N), jnp.float32)
    betas = jax.random.normal(k3, (B, M), jnp.float32)               # gdu_layer.betas
    pred = jax.random.normal(k4, (B, C), jnp.float32)                # model output
    tgt = jax.random.normal(k5, (B, C), jnp.float32)                 # target

    loss = jax.block_until_ready(
        layer_loss_pallas(fv, domain_bases, betas, pred, tgt, **hparams))
    ref = jax.block_until_ready(
        layer_loss_ref(fv, domain_bases, betas, pred, tgt, **hparams))
    assert jnp.allclose(loss, ref, rtol=5e-2, atol=5e-2), (loss, ref)
    print("KERNEL_OK")
</pallas_src>

<mosaic_0001>
module attributes {stable_mosaic.version = 11 : i64} {
  func.func @_layer_loss_kernel(%arg0: memref<8x128xf32, #tpu.memory_space<vmem>>, %arg1: memref<32x128xf32, #tpu.memory_space<vmem>>, %arg2: memref<8x4xf32, #tpu.memory_space<vmem>>, %arg3: memref<8x4xf32, #tpu.memory_space<vmem>>, %arg4: memref<8x4xf32, #tpu.memory_space<vmem>>, %arg5: memref<1x1xf32, #tpu.memory_space<vmem>>) attributes {dimension_semantics = [], scalar_prefetch = 0 : i64, scratch_operands = 0 : i64, tpu.core_type = #tpu.core_type<tc>} {
    %c0 = arith.constant 0 : index
    %c0_0 = arith.constant 0 : index
    %0 = vector.load %arg0[%c0, %c0_0] : memref<8x128xf32, #tpu.memory_space<vmem>>, vector<8x128xf32>
    %c0_1 = arith.constant 0 : index
    %c0_2 = arith.constant 0 : index
    %1 = vector.load %arg1[%c0_1, %c0_2] : memref<32x128xf32, #tpu.memory_space<vmem>>, vector<32x128xf32>
    %c0_3 = arith.constant 0 : index
    %c0_4 = arith.constant 0 : index
    %2 = vector.load %arg2[%c0_3, %c0_4] : memref<8x4xf32, #tpu.memory_space<vmem>>, vector<8x4xf32>
    %c0_5 = arith.constant 0 : index
    %c0_6 = arith.constant 0 : index
    %3 = vector.load %arg3[%c0_5, %c0_6] : memref<8x4xf32, #tpu.memory_space<vmem>>, vector<8x4xf32>
    %c0_7 = arith.constant 0 : index
    %c0_8 = arith.constant 0 : index
    %4 = vector.load %arg4[%c0_7, %c0_8] : memref<8x4xf32, #tpu.memory_space<vmem>>, vector<8x4xf32>
    %5 = tpu.iota {dimensions = array<i32: 0>} : vector<4x32xi32>
    %6 = tpu.iota {dimensions = array<i32: 1>} : vector<4x32xi32>
    %c8_i32 = arith.constant 8 : i32
    %7 = vector.broadcast %c8_i32 : i32 to vector<4x32xi32>
    %8 = arith.muli %5, %7 : vector<4x32xi32>
    %9 = arith.cmpi sge, %6, %8 : vector<4x32xi32>
    %c1_i32 = arith.constant 1 : i32
    %10 = vector.broadcast %c1_i32 : i32 to vector<4x32xi32>
    %11 = arith.addi %5, %10 : vector<4x32xi32>
    %c8_i32_9 = arith.constant 8 : i32
    %12 = vector.broadcast %c8_i32_9 : i32 to vector<4x32xi32>
    %13 = arith.muli %11, %12 : vector<4x32xi32>
    %14 = arith.cmpi slt, %6, %13 : vector<4x32xi32>
    %15 = arith.andi %9, %14 : vector<4x32xi1>
    %cst = arith.constant 1.250000e-01 : f32
    %cst_10 = arith.constant 0.000000e+00 : f32
    %16 = vector.broadcast %cst : f32 to vector<4x32xf32>
    %17 = vector.broadcast %cst_10 : f32 to vector<4x32xf32>
    %18 = arith.select %15, %16, %17 : vector<4x32xi1>, vector<4x32xf32>
    %19 = arith.subf %3, %4 : vector<8x4xf32>
    %20 = arith.mulf %19, %19 : vector<8x4xf32>
    %cst_11 = arith.constant dense<0.000000e+00> : vector<8xf32>
    %21 = vector.multi_reduction <add>, %20, %cst_11 [1] : vector<8x4xf32> to vector<8xf32>
    %22 = vector.shape_cast %21 : vector<8xf32> to vector<8x1xf32>
    %cst_12 = arith.constant 4.000000e+00 : f32
    %23 = vector.broadcast %cst_12 : f32 to vector<8x1xf32>
    %24 = arith.divf %22, %23 : vector<8x1xf32>
    %cst_13 = arith.constant dense<0.000000e+00> : vector<1xf32>
    %25 = vector.multi_reduction <add>, %24, %cst_13 [0] : vector<8x1xf32> to vector<1xf32>
    %26 = vector.shape_cast %25 : vector<1xf32> to vector<1x1xf32>
    %cst_14 = arith.constant 8.000000e+00 : f32
    %27 = vector.broadcast %cst_14 : f32 to vector<1x1xf32>
    %28 = arith.divf %26, %27 : vector<1x1xf32>
    %cst_15 = arith.constant dense<0.000000e+00> : vector<32x32xf32>
    %29 = tpu.matmul %1, %1, %cst_15 {dimension_numbers = #tpu.dot_dimension_numbers<[1], [1], [0], [0], [0, 0, 1, 0], [], []>} : vector<32x128xf32>, vector<32x128xf32>, vector<32x32xf32> -> vector<32x32xf32>
    %30 = tpu.iota {dimensions = array<i32: 0>} : vector<32x32xi32>
    %31 = tpu.iota {dimensions = array<i32: 1>} : vector<32x32xi32>
    %32 = arith.cmpi eq, %30, %31 : vector<32x32xi32>
    %cst_16 = arith.constant 0.000000e+00 : f32
    %33 = vector.broadcast %cst_16 : f32 to vector<32x32xf32>
    %34 = arith.select %32, %29, %33 : vector<32x32xi1>, vector<32x32xf32>
    %cst_17 = arith.constant dense<0.000000e+00> : vector<32xf32>
    %35 = vector.multi_reduction <add>, %34, %cst_17 [0] : vector<32x32xf32> to vector<32xf32>
    %36 = vector.shape_cast %35 : vector<32xf32> to vector<1x32xf32>
    %cst_18 = arith.constant dense<0.000000e+00> : vector<32xf32>
    %37 = vector.multi_reduction <add>, %34, %cst_18 [1] : vector<32x32xf32> to vector<32xf32>
    %38 = vector.shape_cast %37 : vector<32xf32> to vector<32x1xf32>
    %cst_19 = arith.constant dense<0.000000e+00> : vector<8x32xf32>
    %39 = tpu.matmul %0, %1, %cst_19 {dimension_numbers = #tpu.dot_dimension_numbers<[1], [1], [0], [0], [0, 0, 1, 0], [], []>} : vector<8x128xf32>, vector<32x128xf32>, vector<8x32xf32> -> vector<8x32xf32>
    %40 = arith.mulf %0, %0 : vector<8x128xf32>
    %cst_20 = arith.constant dense<0.000000e+00> : vector<8xf32>
    %41 = vector.multi_reduction <add>, %40, %cst_20 [1] : vector<8x128xf32> to vector<8xf32>
    %42 = vector.shape_cast %41 : vector<8xf32> to vector<8x1xf32>
    %43 = vector.broadcast %42 : vector<8x1xf32> to vector<8x32xf32>
    %44 = vector.broadcast %36 : vector<1x32xf32> to vector<8x32xf32>
    %45 = arith.addf %43, %44 : vector<8x32xf32>
    %cst_21 = arith.constant 2.000000e+00 : f32
    %46 = vector.broadcast %cst_21 : f32 to vector<8x32xf32>
    %47 = arith.mulf %46, %39 : vector<8x32xf32>
    %48 = arith.subf %45, %47 : vector<8x32xf32>
    %cst_22 = arith.constant 0.000000e+00 : f32
    %49 = vector.broadcast %cst_22 : f32 to vector<8x32xf32>
    %50 = arith.maximumf %48, %49 : vector<8x32xf32>
    %cst_23 = arith.constant -1.250000e-01 : f32
    %51 = vector.broadcast %cst_23 : f32 to vector<8x32xf32>
    %52 = arith.mulf %50, %51 : vector<8x32xf32>
    %53 = math.exp %52 : vector<8x32xf32>
    %cst_24 = arith.constant dense<0.000000e+00> : vector<8x4xf32>
    %54 = tpu.matmul %53, %18, %cst_24 {dimension_numbers = #tpu.dot_dimension_numbers<[1], [1], [0], [0], [0, 0, 1, 0], [], []>} : vector<8x32xf32>, vector<4x32xf32>, vector<8x4xf32> -> vector<8x4xf32>
    %55 = arith.mulf %2, %54 : vector<8x4xf32>
    %cst_25 = arith.constant dense<0.000000e+00> : vector<8xf32>
    %56 = vector.multi_reduction <add>, %55, %cst_25 [1] : vector<8x4xf32> to vector<8xf32>
    %57 = vector.shape_cast %56 : vector<8xf32> to vector<8x1xf32>
    %cst_26 = arith.constant -2.000000e+00 : f32
    %58 = vector.broadcast %cst_26 : f32 to vector<8x1xf32>
    %59 = arith.mulf %58, %57 : vector<8x1xf32>
    %cst_27 = arith.constant dense<0.000000e+00> : vector<8xf32>
    %60 = vector.multi_reduction <add>, %59, %cst_27 [1] : vector<8x1xf32> to vector<8xf32>
    %61 = vector.shape_cast %60 : vector<8xf32> to vector<8x1xf32>
    %cst_28 = arith.constant 1.000000e+00 : f32
    %62 = vector.broadcast %cst_28 : f32 to vector<8x1xf32>
    %63 = arith.divf %61, %62 : vector<8x1xf32>
    %cst_29 = arith.constant dense<0.000000e+00> : vector<1xf32>
    %64 = vector.multi_reduction <add>, %63, %cst_29 [0] : vector<8x1xf32> to vector<1xf32>
    %65 = vector.shape_cast %64 : vector<1xf32> to vector<1x1xf32>
    %cst_30 = arith.constant 8.000000e+00 : f32
    %66 = vector.broadcast %cst_30 : f32 to vector<1x1xf32>
    %67 = arith.divf %65, %66 : vector<1x1xf32>
    %68 = vector.broadcast %38 : vector<32x1xf32> to vector<32x32xf32>
    %69 = vector.broadcast %36 : vector<1x32xf32> to vector<32x32xf32>
    %70 = arith.addf %68, %69 : vector<32x32xf32>
    %cst_31 = arith.constant 2.000000e+00 : f32
    %71 = vector.broadcast %cst_31 : f32 to vector<32x32xf32>
    %72 = arith.mulf %71, %29 : vector<32x32xf32>
    %73 = arith.subf %70, %72 : vector<32x32xf32>
    %cst_32 = arith.constant 0.000000e+00 : f32
    %74 = vector.broadcast %cst_32 : f32 to vector<32x32xf32>
    %75 = arith.maximumf %73, %74 : vector<32x32xf32>
    %cst_33 = arith.constant -1.250000e-01 : f32
    %76 = vector.broadcast %cst_33 : f32 to vector<32x32xf32>
    %77 = arith.mulf %75, %76 : vector<32x32xf32>
    %78 = math.exp %77 : vector<32x32xf32>
    %cst_34 = arith.constant dense<0.000000e+00> : vector<4x32xf32>
    %79 = tpu.matmul %18, %78, %cst_34 {dimension_numbers = #tpu.dot_dimension_numbers<[1], [0], [0], [1], [0, 0, 1, 1], [], []>} : vector<4x32xf32>, vector<32x32xf32>, vector<4x32xf32> -> vector<4x32xf32>
    %cst_35 = arith.constant dense<0.000000e+00> : vector<4x4xf32>
    %80 = tpu.matmul %79, %18, %cst_35 {dimension_numbers = #tpu.dot_dimension_numbers<[1], [1], [0], [0], [0, 0, 1, 0], [], []>} : vector<4x32xf32>, vector<4x32xf32>, vector<4x4xf32> -> vector<4x4xf32>
    %cst_36 = arith.constant dense<0.000000e+00> : vector<8x4xf32>
    %81 = tpu.matmul %2, %80, %cst_36 {dimension_numbers = #tpu.dot_dimension_numbers<[1], [0], [0], [1], [0, 0, 1, 1], [], []>} : vector<8x4xf32>, vector<4x4xf32>, vector<8x4xf32> -> vector<8x4xf32>
    %82 = arith.mulf %81, %2 : vector<8x4xf32>
    %cst_37 = arith.constant dense<0.000000e+00> : vector<8xf32>
    %83 = vector.multi_reduction <add>, %82, %cst_37 [1] : vector<8x4xf32> to vector<8xf32>
    %84 = vector.shape_cast %83 : vector<8xf32> to vector<8x1xf32>
    %cst_38 = arith.constant dense<0.000000e+00> : vector<8xf32>
    %85 = vector.multi_reduction <add>, %84, %cst_38 [1] : vector<8x1xf32> to vector<8xf32>
    %86 = vector.shape_cast %85 : vector<8xf32> to vector<8x1xf32>
    %cst_39 = arith.constant 1.000000e+00 : f32
    %87 = vector.broadcast %cst_39 : f32 to vector<8x1xf32>
    %88 = arith.divf %86, %87 : vector<8x1xf32>
    %cst_40 = arith.constant dense<0.000000e+00> : vector<1xf32>
    %89 = vector.multi_reduction <add>, %88, %cst_40 [0] : vector<8x1xf32> to vector<1xf32>
    %90 = vector.shape_cast %89 : vector<1xf32> to vector<1x1xf32>
    %cst_41 = arith.constant 8.000000e+00 : f32
    %91 = vector.broadcast %cst_41 : f32 to vector<1x1xf32>
    %92 = arith.divf %90, %91 : vector<1x1xf32>
    %cst_42 = arith.constant 1.000000e+00 : f32
    %93 = vector.broadcast %cst_42 : f32 to vector<1x1xf32>
    %94 = arith.addf %93, %67 : vector<1x1xf32>
    %95 = arith.addf %94, %92 : vector<1x1xf32>
    %cst_43 = arith.constant 1.000000e+00 : f32
    %96 = vector.broadcast %cst_43 : f32 to vector<1x1xf32>
    %97 = arith.mulf %96, %95 : vector<1x1xf32>
    %98 = arith.addf %28, %97 : vector<1x1xf32>
    %99 = tpu.iota {dimensions = array<i32: 0>} : vector<4x4xi32>
    %100 = tpu.iota {dimensions = array<i32: 1>} : vector<4x4xi32>
    %101 = arith.cmpi eq, %99, %100 : vector<4x4xi32>
    %cst_44 = arith.constant 0.000000e+00 : f32
    %102 = vector.broadcast %cst_44 : f32 to vector<4x4xf32>
    %103 = arith.select %101, %102, %80 : vector<4x4xi1>, vector<4x4xf32>
    %cst_45 = arith.constant dense<0.000000e+00> : vector<4x4xf32>
    %104 = tpu.matmul %103, %103, %cst_45 {dimension_numbers = #tpu.dot_dimension_numbers<[1], [0], [0], [1], [0, 0, 1, 1], [], []>} : vector<4x4xf32>, vector<4x4xf32>, vector<4x4xf32> -> vector<4x4xf32>
    %cst_46 = arith.constant dense<0.000000e+00> : vector<4x4xf32>
    %105 = tpu.matmul %104, %104, %cst_46 {dimension_numbers = #tpu.dot_dimension_numbers<[1], [0], [0], [1], [0, 0, 1, 1], [], []>} : vector<4x4xf32>, vector<4x4xf32>, vector<4x4xf32> -> vector<4x4xf32>
    %106 = arith.mulf %105, %105 : vector<4x4xf32>
    %cst_47 = arith.constant dense<0.000000e+00> : vector<4xf32>
    %107 = vector.multi_reduction <add>, %106, %cst_47 [1] : vector<4x4xf32> to vector<4xf32>
    %108 = vector.shape_cast %107 : vector<4xf32> to vector<4x1xf32>
    %cst_48 = arith.constant dense<0.000000e+00> : vector<1xf32>
    %109 = vector.multi_reduction <add>, %108, %cst_48 [0] : vector<4x1xf32> to vector<1xf32>
    %110 = vector.shape_cast %109 : vector<1xf32> to vector<1x1xf32>
    %cst_49 = arith.constant 1.000000e-30 : f32
    %111 = vector.broadcast %cst_49 : f32 to vector<1x1xf32>
    %112 = arith.addf %110, %111 : vector<1x1xf32>
    %113 = math.rsqrt %112 : vector<1x1xf32>
    %114 = vector.broadcast %113 : vector<1x1xf32> to vector<4x4xf32>
    %115 = arith.mulf %105, %114 : vector<4x4xf32>
    %cst_50 = arith.constant dense<0.000000e+00> : vector<4x4xf32>
    %116 = tpu.matmul %115, %115, %cst_50 {dimension_numbers = #tpu.dot_dimension_numbers<[1], [0], [0], [1], [0, 0, 1, 1], [], []>} : vector<4x4xf32>, vector<4x4xf32>, vector<4x4xf32> -> vector<4x4xf32>
    %117 = arith.mulf %116, %116 : vector<4x4xf32>
    %cst_51 = arith.constant dense<0.000000e+00> : vector<4xf32>
    %118 = vector.multi_reduction <add>, %117, %cst_51 [1] : vector<4x4xf32> to vector<4xf32>
    %119 = vector.shape_cast %118 : vector<4xf32> to vector<4x1xf32>
    %cst_52 = arith.constant dense<0.000000e+00> : vector<1xf32>
    %120 = vector.multi_reduction <add>, %119, %cst_52 [0] : vector<4x1xf32> to vector<1xf32>
    %121 = vector.shape_cast %120 : vector<1xf32> to vector<1x1xf32>
    %cst_53 = arith.constant 1.000000e-30 : f32
    %122 = vector.broadcast %cst_53 : f32 to vector<1x1xf32>
    %123 = arith.addf %121, %122 : vector<1x1xf32>
    %124 = math.rsqrt %123 : vector<1x1xf32>
    %125 = vector.broadcast %124 : vector<1x1xf32> to vector<4x4xf32>
    %126 = arith.mulf %116, %125 : vector<4x4xf32>
    %cst_54 = arith.constant dense<0.000000e+00> : vector<4x4xf32>
    %127 = tpu.matmul %126, %126, %cst_54 {dimension_numbers = #tpu.dot_dimension_numbers<[1], [0], [0], [1], [0, 0, 1, 1], [], []>} : vector<4x4xf32>, vector<4x4xf32>, vector<4x4xf32> -> vector<4x4xf32>
    %128 = arith.mulf %127, %127 : vector<4x4xf32>
    %cst_55 = arith.constant dense<0.000000e+00> : vector<4xf32>
    %129 = vector.multi_reduction <add>, %128, %cst_55 [1] : vector<4x4xf32> to vector<4xf32>
    %130 = vector.shape_cast %129 : vector<4xf32> to vector<4x1xf32>
    %cst_56 = arith.constant dense<0.000000e+00> : vector<1xf32>
    %131 = vector.multi_reduction <add>, %130, %cst_56 [0] : vector<4x1xf32> to vector<1xf32>
    %132 = vector.shape_cast %131 : vector<1xf32> to vector<1x1xf32>
    %cst_57 = arith.constant 1.000000e-30 : f32
    %133 = vector.broadcast %cst_57 : f32 to vector<1x1xf32>
    %134 = arith.addf %132, %133 : vector<1x1xf32>
    %135 = math.rsqrt %134 : vector<1x1xf32>
    %136 = vector.broadcast %135 : vector<1x1xf32> to vector<4x4xf32>
    %137 = arith.mulf %127, %136 : vector<4x4xf32>
    %cst_58 = arith.constant dense<0.000000e+00> : vector<4x4xf32>
    %138 = tpu.matmul %137, %137, %cst_58 {dimension_numbers = #tpu.dot_dimension_numbers<[1], [0], [0], [1], [0, 0, 1, 1], [], []>} : vector<4x4xf32>, vector<4x4xf32>, vector<4x4xf32> -> vector<4x4xf32>
    %139 = arith.mulf %138, %138 : vector<4x4xf32>
    %cst_59 = arith.constant dense<0.000000e+00> : vector<4xf32>
    %140 = vector.multi_reduction <add>, %139, %cst_59 [1] : vector<4x4xf32> to vector<4xf32>
    %141 = vector.shape_cast %140 : vector<4xf32> to vector<4x1xf32>
    %cst_60 = arith.constant dense<0.000000e+00> : vector<1xf32>
    %142 = vector.multi_reduction <add>, %141, %cst_60 [0] : vector<4x1xf32> to vector<1xf32>
    %143 = vector.shape_cast %142 : vector<1xf32> to vector<1x1xf32>
    %cst_61 = arith.constant 1.000000e-30 : f32
    %144 = vector.broadcast %cst_61 : f32 to vector<1x1xf32>
    %145 = arith.addf %143, %144 : vector<1x1xf32>
    %146 = math.rsqrt %145 : vector<1x1xf32>
    %147 = vector.broadcast %146 : vector<1x1xf32> to vector<4x4xf32>
    %148 = arith.mulf %138, %147 : vector<4x4xf32>
    %cst_62 = arith.constant dense<0.000000e+00> : vector<4x4xf32>
    %149 = tpu.matmul %148, %148, %cst_62 {dimension_numbers = #tpu.dot_dimension_numbers<[1], [0], [0], [1], [0, 0, 1, 1], [], []>} : vector<4x4xf32>, vector<4x4xf32>, vector<4x4xf32> -> vector<4x4xf32>
    %150 = arith.mulf %149, %149 : vector<4x4xf32>
    %cst_63 = arith.constant dense<0.000000e+00> : vector<4xf32>
    %151 = vector.multi_reduction <add>, %150, %cst_63 [1] : vector<4x4xf32> to vector<4xf32>
    %152 = vector.shape_cast %151 : vector<4xf32> to vector<4x1xf32>
    %cst_64 = arith.constant dense<0.000000e+00> : vector<1xf32>
    %153 = vector.multi_reduction <add>, %152, %cst_64 [0] : vector<4x1xf32> to vector<1xf32>
    %154 = vector.shape_cast %153 : vector<1xf32> to vector<1x1xf32>
    %cst_65 = arith.constant 1.000000e-30 : f32
    %155 = vector.broadcast %cst_65 : f32 to vector<1x1xf32>
    %156 = arith.addf %154, %155 : vector<1x1xf32>
    %157 = math.rsqrt %156 : vector<1x1xf32>
    %158 = vector.broadcast %157 : vector<1x1xf32> to vector<4x4xf32>
    %159 = arith.mulf %149, %158 : vector<4x4xf32>
    %cst_66 = arith.constant dense<0.000000e+00> : vector<4x4xf32>
    %160 = tpu.matmul %159, %159, %cst_66 {dimension_numbers = #tpu.dot_dimension_numbers<[1], [0], [0], [1], [0, 0, 1, 1], [], []>} : vector<4x4xf32>, vector<4x4xf32>, vector<4x4xf32> -> vector<4x4xf32>
    %161 = arith.mulf %160, %160 : vector<4x4xf32>
    %cst_67 = arith.constant dense<0.000000e+00> : vector<4xf32>
    %162 = vector.multi_reduction <add>, %161, %cst_67 [1] : vector<4x4xf32> to vector<4xf32>
    %163 = vector.shape_cast %162 : vector<4xf32> to vector<4x1xf32>
    %cst_68 = arith.constant dense<0.000000e+00> : vector<1xf32>
    %164 = vector.multi_reduction <add>, %163, %cst_68 [0] : vector<4x1xf32> to vector<1xf32>
    %165 = vector.shape_cast %164 : vector<1xf32> to vector<1x1xf32>
    %cst_69 = arith.constant 1.000000e-30 : f32
    %166 = vector.broadcast %cst_69 : f32 to vector<1x1xf32>
    %167 = arith.addf %165, %166 : vector<1x1xf32>
    %168 = math.rsqrt %167 : vector<1x1xf32>
    %169 = vector.broadcast %168 : vector<1x1xf32> to vector<4x4xf32>
    %170 = arith.mulf %160, %169 : vector<4x4xf32>
    %cst_70 = arith.constant dense<0.000000e+00> : vector<4xf32>
    %171 = vector.multi_reduction <add>, %170, %cst_70 [1] : vector<4x4xf32> to vector<4xf32>
    %172 = vector.shape_cast %171 : vector<4xf32> to vector<4x1xf32>
    %cst_71 = arith.constant dense<0.000000e+00> : vector<4xf32>
    %173 = vector.multi_reduction <add>, %170, %cst_71 [0] : vector<4x4xf32> to vector<4xf32>
    %174 = vector.shape_cast %173 : vector<4xf32> to vector<1x4xf32>
    %175 = vector.broadcast %172 : vector<4x1xf32> to vector<4x4xf32>
    %176 = arith.mulf %104, %175 : vector<4x4xf32>
    %177 = vector.broadcast %174 : vector<1x4xf32> to vector<4x4xf32>
    %178 = arith.mulf %176, %177 : vector<4x4xf32>
    %cst_72 = arith.constant dense<0.000000e+00> : vector<4xf32>
    %179 = vector.multi_reduction <add>, %178, %cst_72 [1] : vector<4x4xf32> to vector<4xf32>
    %180 = vector.shape_cast %179 : vector<4xf32> to vector<4x1xf32>
    %cst_73 = arith.constant dense<0.000000e+00> : vector<1xf32>
    %181 = vector.multi_reduction <add>, %180, %cst_73 [0] : vector<4x1xf32> to vector<1xf32>
    %182 = vector.shape_cast %181 : vector<1xf32> to vector<1x1xf32>
    %183 = arith.mulf %172, %172 : vector<4x1xf32>
    %cst_74 = arith.constant dense<0.000000e+00> : vector<1xf32>
    %184 = vector.multi_reduction <add>, %183, %cst_74 [0] : vector<4x1xf32> to vector<1xf32>
    %185 = vector.shape_cast %184 : vector<1xf32> to vector<1x1xf32>
    %cst_75 = arith.constant 0.000000e+00 : f32
    %186 = vector.broadcast %cst_75 : f32 to vector<1x1xf32>
    %187 = arith.maximumf %182, %186 : vector<1x1xf32>
    %cst_76 = arith.constant 1.000000e-30 : f32
    %188 = vector.broadcast %cst_76 : f32 to vector<1x1xf32>
    %189 = arith.maximumf %185, %188 : vector<1x1xf32>
    %190 = arith.divf %187, %189 : vector<1x1xf32>
    %191 = math.sqrt %190 : vector<1x1xf32>
    %cst_77 = arith.constant 1.000000e-01 : f32
    %192 = vector.broadcast %cst_77 : f32 to vector<1x1xf32>
    %193 = arith.mulf %192, %191 : vector<1x1xf32>
    %194 = arith.addf %98, %193 : vector<1x1xf32>
    %195 = math.absf %2 : vector<8x4xf32>
    %cst_78 = arith.constant dense<0.000000e+00> : vector<8xf32>
    %196 = vector.multi_reduction <add>, %195, %cst_78 [1] : vector<8x4xf32> to vector<8xf32>
    %197 = vector.shape_cast %196 : vector<8xf32> to vector<8x1xf32>
    %cst_79 = arith.constant dense<0.000000e+00> : vector<8xf32>
    %198 = vector.multi_reduction <add>, %197, %cst_79 [1] : vector<8x1xf32> to vector<8xf32>
    %199 = vector.shape_cast %198 : vector<8xf32> to vector<8x1xf32>
    %cst_80 = arith.constant 1.000000e+00 : f32
    %200 = vector.broadcast %cst_80 : f32 to vector<8x1xf32>
    %201 = arith.divf %199, %200 : vector<8x1xf32>
    %cst_81 = arith.constant dense<0.000000e+00> : vector<1xf32>
    %202 = vector.multi_reduction <add>, %201, %cst_81 [0] : vector<8x1xf32> to vector<1xf32>
    %203 = vector.shape_cast %202 : vector<1xf32> to vector<1x1xf32>
    %cst_82 = arith.constant 8.000000e+00 : f32
    %204 = vector.broadcast %cst_82 : f32 to vector<1x1xf32>
    %205 = arith.divf %203, %204 : vector<1x1xf32>
    %cst_83 = arith.constant 0.00999999977 : f32
    %206 = vector.broadcast %cst_83 : f32 to vector<1x1xf32>
    %207 = arith.mulf %206, %205 : vector<1x1xf32>
    %208 = arith.addf %194, %207 : vector<1x1xf32>
    %c0_84 = arith.constant 0 : index
    %c0_85 = arith.constant 0 : index
    %209 = vector.load %arg5[%c0_84, %c0_85] : memref<1x1xf32, #tpu.memory_space<vmem>>, vector<1x1xf32>
    tpu.vector_store %arg5[%c0_84, %c0_85], %208 {strides = array<i32>} : memref<1x1xf32, #tpu.memory_space<vmem>>, vector<1x1xf32>,
    return
  }
}

</mosaic_0001>

<bundles_post_ra>
// kernel: tpu_custom_call.1
= control target key start
LH: loop header
LB: loop body
LE: loop exit
PB: predicated region body
PF: predicated region fallthrough
CT: control target
= control target key end

     0   :  { %10 = vsyncpa [#allocation3], 0  ;;  %s994_s0 = inlined_call_operand.vmem [shape: f32[8,128], index: 0, kind: input, shape index: {}]   ;;  %s995_s1 = inlined_call_operand.hbm [shape: f32[32,128], index: 1, kind: input, shape index: {}]   ;;  %s996_s2 = inlined_call_operand.vmem [shape: f32[8,4], index: 2, kind: input, shape index: {}]   ;;  %s997_s3 = inlined_call_operand.vmem [shape: f32[8,4], index: 3, kind: input, shape index: {}]   ;;  %s998_s4 = inlined_call_operand.vmem [shape: f32[8,4], index: 4, kind: input, shape index: {}]   ;;  %s999_s5 = inlined_call_operand.hbm [shape: f32[1,1], index: 5, kind: output, shape index: {}]  }
   0x1   :  { %11 = vsyncpa [#allocation4], 0  ;;  %s18_s20 = sshll.u32 %s995_s1, 4  ;;  %s846_s21 = smov [#allocation2]   ;;  %s19_s20 = int_to_ptr.hbm [resolvable:$true] %s18_s20 }
   0x2   :  { %s20_s22 = sshll.u32 %s846_s21, 4  ;;  %s847_s23 = smov 128   ;;  %s21_s22 = int_to_ptr.vmem [resolvable:$true] %s20_s22 }
   0x3   :  { %s848_s24 = smov 8  }
   0x4   :  { %26 = dma.hbm_to_vmem [thread:$0]  %s19_s20, 512, %s21_s22, [#allocation3], %s847_s23, %s847_s23, %s848_s24  }
   0x5   :  { %842 = dma.done.wait [#allocation3], 512  }
   0x6   :  { %843 = vsyncadd [#allocation3], 4294966784  ;;  %v41_v0 = vld [vmem:[#allocation2 + $0x18] sm:$0xff]  ;;  %v40_v1 = vld [vmem:[#allocation2 + $0x10] sm:$0xff]  ;;  %v45_v6 = vlaneseq  ;;  %vm124_vm1 = vcmask 261120   ;;  %v849_v24 = vmov 0.0  }
   0x7   :  { %96 = vmatpush.xpose.msra.mxu0 %v41_v0  ;;  %158 = vmatpush.xpose.msra.mxu1 %v41_v0  ;;  %v39_v2 = vld [vmem:[#allocation2 + $0x8] sm:$0xff]  ;;  %v37_v3 = vld [vmem:[%s994_s0] sm:$0xff]  ;;  %vm289_vm8 = vcmask 1043456   ;;  %vm58_vm9 = vcmask 31744   ;;  %vm380_vm10 = vcmask 27648   ;;  %s726_s7 = sshll.u32 %s999_s5, 4  ;;  %s727_s7 = int_to_ptr.hbm [resolvable:$true] %s726_s7 }
   0x8   :  { %v166_v4 = vmul.f32 %v37_v3, %v37_v3  ;;  %v38_v5 = vld [vmem:[#allocation2] sm:$0xff]  ;;  %v891_v8 = vshrl.u32 %v45_v6, 7  ;;  %v894_v10 = vand.u32 127, %v45_v6 }
   0xa   :  { %167 = vadd.xlane.f32.xlu2 %v166_v4  ;;  %v113_v9 = vadd.s32 8, %v891_v8  ;;  %vm116_vm2 = vcmp.eq.s32.totalorder %v891_v8, %v894_v10  ;;  %v114_v14 = vadd.s32 16, %v891_v8  ;;  %v51_v17 = vadd.s32 1, %v891_v8 }
   0xb   :  { %97 = vmatpush.xpose.msra.mxu0 %v40_v1  ;;  %159 = vmatpush.xpose.msra.mxu1 %v40_v1  ;;  %v115_v19 = vadd.s32 24, %v891_v8  ;;  %v49_v20 = vmul.u32 8, %v891_v8 }
   0xc   :  { %vm117_vm0 = vcmp.eq.s32.totalorder %v113_v9, %v894_v10  ;;  %vm118_vm3 = vcmp.eq.s32.totalorder %v114_v14, %v894_v10  ;;  %v52_v21 = vmul.u32 8, %v51_v17 }
   0xd   :  { %vm50_vm4 = vcmp.ge.s32.totalorder %v894_v10, %v49_v20  ;;  %vm119_vm7 = vcmp.eq.s32.totalorder %v115_v19, %v894_v10  ;;  %v931_v20 = vld [vmem:[%s996_s2] sm:$0xff] }
   0xe   :  { %vm53_vm5 = vcmp.lt.s32.totalorder %v894_v10, %v52_v21 }
   0xf   :  { %98 = vmatpush.xpose.msra.mxu0 %v39_v2  ;;  %160 = vmatpush.xpose.msra.mxu1 %v39_v2  ;;  %vm54_vm6 = vmand %vm50_vm4, %vm53_vm5 }
  0x10   :  { %v914_v25 = vsel %vm54_vm6, 0.125, %v849_v24 }
  0x11   :  { %736 = vmatpush.xpose.msk.msra.mxu2 %vm124_vm1, %v914_v25 }
  0x13   :  { %99 = vmatpush.xpose.msra.mxu0 %v38_v5  ;;  %161 = vmatpush.xpose.msra.mxu1 %v38_v5 }
  0x15   :  { %739 = vmatpush.xpose.msk.msrb.mxu2 %vm124_vm1, %v914_v25 }
  0x16   :  { %100 = vmatmul.f32.vlgmr.msra.gmra.mxu0 %v38_v5  ;;  %162 = vmatmul.f32.vlgmr.msra.gmra.mxu1 %v37_v3 }
  0x1e   :  { %103 = vmatmul.f32.gmra.mxu0 %v39_v2 }
  0x26   :  { %106 = vmatmul.f32.gmra.mxu0 %v40_v1 }
  0x2e   :  { %109 = vmatmul.f32.gmra.mxu0 %v41_v0 }
  0x7d   :  { %v168_v38 = vpop.xlane.xlu2 %167 }
  0x93   :  { %v889_v7 = vpop.f32.mrf.mxu0  ;;  %v163_v36 = vpop.f32.mrf.mxu1 }
  0x94   :  { %v120_v15 = vsel %vm116_vm2, %v889_v7, 0.0  ;;  %v170_v40 = vmul.f32 2.0, %v163_v36  ;;  %v219_v56 = vmul.f32 2.0, %v889_v7 }
  0x95   :  { %v125_v18 = vsel %vm124_vm1, %v120_v15, 0.0 }
  0x9b   :  { %v104_v11 = vpop.f32.mrf.mxu0 }
  0x9c   :  { %v121_v12 = vsel %vm117_vm0, %v104_v11, 0.0  ;;  %v220_v53 = vmul.f32 2.0, %v104_v11 }
  0x9d   :  { %v126_v13 = vsel %vm124_vm1, %v121_v12, 0.0 }
  0x9e   :  { %140 = vadd.xlane.f32.xlu1 %v126_v13  ;;  %v127_v26 = vadd.f32 %v126_v13, %v125_v18 }
  0xa3   :  { %v107_v16 = vpop.f32.mrf.mxu0 }
  0xa4   :  { %v122_v22 = vsel %vm118_vm3, %v107_v16, 0.0  ;;  %v221_v62 = vmul.f32 2.0, %v107_v16 }
  0xa5   :  { %v128_v23 = vsel %vm124_vm1, %v122_v22, 0.0 }
  0xa6   :  { %138 = vadd.xlane.f32.xlu1 %v125_v18  ;;  %v129_v29 = vadd.f32 %v128_v23, %v127_v26 }
  0xab   :  { %v110_v27 = vpop.f32.mrf.mxu0 }
  0xac   :  { %v123_v28 = vsel %vm119_vm7, %v110_v27, 0.0  ;;  %v222_v50 = vmul.f32 2.0, %v110_v27 }
  0xad   :  { %v130_v30 = vsel %vm124_vm1, %v123_v28, 0.0 }
  0xae   :  { %144 = vadd.xlane.f32.xlu0 %v130_v30  ;;  %v131_v31 = vadd.f32 %v130_v30, %v129_v29 }
  0xb0   :  { %v132_v32 = vrot.slane %v131_v31, 4 }
  0xb2   :  { %v133_v33 = vadd.f32 %v132_v32, %v131_v31 }
  0xb4   :  { %v134_v34 = vrot.slane %v133_v33, 2 }
  0xb6   :  { %142 = vadd.xlane.f32.xlu0 %v128_v23  ;;  %v135_v35 = vadd.f32 %v134_v34, %v133_v33 }
  0xb8   :  { %v136_v37 = vrot.slane %v135_v35, 1 }
  0xba   :  { %v137_v39 = vadd.f32 %v136_v37, %v135_v35 }
  0xbc   :  { %v169_v41 = vadd.f32 %v168_v38, %v137_v39 }
  0xbe   :  { %v171_v42 = vsub.f32 %v169_v41, %v170_v40 }
  0xc0   :  { %v172_v43 = vmax.f32 %v171_v42, 0.0 }
  0xc2   :  { %v173_v44 = vmul.f32 -0.125, %v172_v43 }
  0xc4   :  { %v174_v45 = vmul.f32 1.442695, %v173_v44 }
  0xc6   :  { %764 = vpow2.f32 %v174_v45 }
  0xcc   :  { %v765_v46 = vpop.eup %764 }
  0xcd   :  { %737 = vmatmul.msk.f32.vlgmr.msra.gmra.mxu2 %vm124_vm1, %v765_v46 }
 0x111   :  { %v141_v47 = vpop.xlane.xlu1 %140 }
 0x112   :  { %v216_v51 = vadd.f32 %v141_v47, %v137_v39 }
 0x114   :  { %v224_v57 = vsub.f32 %v216_v51, %v220_v53 }
 0x116   :  { %v228_v63 = vmax.f32 %v224_v57, 0.0 }
 0x118   :  { %v232_v4 = vmul.f32 -0.125, %v228_v63 }
 0x119   :  { %v139_v48 = vpop.xlane.xlu1 %138 }
 0x11a   :  { %v215_v54 = vadd.f32 %v139_v48, %v137_v39  ;;  %v237_v12 = vmul.f32 1.442695, %v232_v4 }
 0x11c   :  { %v223_v59 = vsub.f32 %v215_v54, %v219_v56 }
 0x11e   :  { %v227_v2 = vmax.f32 %v223_v59, 0.0 }
 0x120   :  { %v231_v6 = vmul.f32 -0.125, %v227_v2 }
 0x121   :  { %v145_v49 = vpop.xlane.xlu0 %144 }
 0x122   :  { %v218_v52 = vadd.f32 %v145_v49, %v137_v39  ;;  %v235_v7 = vmul.f32 1.442695, %v231_v6 }
 0x124   :  { %v226_v55 = vsub.f32 %v218_v52, %v222_v50 }
 0x126   :  { %v230_v58 = vmax.f32 %v226_v55, 0.0 }
 0x128   :  { %v234_v60 = vmul.f32 -0.125, %v230_v58 }
 0x129   :  { %v143_v61 = vpop.xlane.xlu0 %142 }
 0x12a   :  { %v217_v0 = vadd.f32 %v143_v61, %v137_v39  ;;  %v241_v1 = vmul.f32 1.442695, %v234_v60 }
 0x12c   :  { %v225_v3 = vsub.f32 %v217_v0, %v221_v62  ;;  %766 = vpow2.f32 %v241_v1 }
 0x12e   :  { %v229_v5 = vmax.f32 %v225_v3, 0.0 }
 0x130   :  { %v233_v9 = vmul.f32 -0.125, %v229_v5 }
 0x132   :  { %v767_v11 = vpop.eup %766  ;;  %v239_v13 = vmul.f32 1.442695, %v233_v9 }
 0x133   :  { %255 = vmatpush.msra.mxu3 %v767_v11 }
 0x134   :  { %768 = vpow2.f32 %v239_v13 }
 0x135   :  { %770 = vpow2.f32 %v237_v12 }
 0x136   :  { %772 = vpow2.f32 %v235_v7 }
 0x13a   :  { %v769_v14 = vpop.eup %768 }
 0x13b   :  { %256 = vmatpush.msra.mxu3 %v769_v14  ;;  %v771_v15 = vpop.eup %770 }
 0x13c   :  { %v773_v16 = vpop.eup %772 }
 0x13d   :  { %257 = vmatpush.msra.mxu3 %v771_v15 }
 0x13f   :  { %258 = vmatpush.msra.mxu3 %v773_v16 }
 0x140   :  { %738 = vmatmul.msk.f32.vlgmr.msra.gmra.mxu3 %vm124_vm1, %v914_v25 }
 0x150   :  { %v926_v18 = vpop.f32.mrf.mxu2 }
 0x1c3   :  { %v260_v17 = vpop.f32.mrf.mxu3 }
 0x1c4   :  { %740 = vmatmul.msk.f32.vlgmr.msrb.gmra.mxu2 %vm124_vm1, %v260_v17 }
 0x247   :  { %v283_v19 = vpop.f32.mrf.mxu2 }
 0x248   :  { %v328_v21 = vsel %vm116_vm2, 0.0, %v283_v19  ;;  %741 = vmatpush.msk.msrb.mxu3 %vm289_vm8, %v283_v19 }
 0x249   :  { %743 = vmatpush.msk.msra.mxu2 %vm289_vm8, %v328_v21  ;;  %742 = vmatmul.msk.f32.vlgmr.msrb.gmra.mxu3 %vm58_vm9, %v931_v20 }
 0x24a   :  { %744 = vmatmul.msk.f32.vlgmr.msra.gmra.mxu2 %vm58_vm9, %v328_v21 }
 0x2cc   :  { %v951_v41 = vpop.f32.mrf.mxu3 }
 0x2cd   :  { %v941_v22 = vpop.f32.mrf.mxu2 }
 0x2ce   :  { %745 = vmatpush.msk.msrb.mxu1 %vm289_vm8, %v941_v22 }
 0x2cf   :  { %746 = vmatmul.msk.f32.vlgmr.msrb.gmra.mxu1 %vm58_vm9, %v941_v22 }
 0x34c   :  { %v376_v8 = vpop.f32.mrf.mxu1 }
 0x34d   :  { %v379_v10 = vmul.f32 %v376_v8, %v376_v8 }
 0x34f   :  { %v381_v23 = vsel %vm380_vm10, %v379_v10, 0.0 }
 0x350   :  { %382 = vadd.xlane.f32.xlu2 %v381_v23 }
 0x3c3   :  { %v383_v24 = vpop.xlane.xlu2 %382 }
 0x3c4   :  { %v384_v25 = vsel %vm289_vm8, %v383_v24, 0.0 }
 0x3c5   :  { %v385_v26 = vrot.slane %v384_v25, 4 }
 0x3c7   :  { %v386_v27 = vadd.f32 %v385_v26, %v384_v25 }
 0x3c9   :  { %v387_v28 = vrot.slane %v386_v27, 2 }
 0x3cb   :  { %v388_v29 = vadd.f32 %v387_v28, %v386_v27 }
 0x3cd   :  { %v389_v30 = vrot.slane %v388_v29, 1 }
 0x3cf   :  { %v390_v31 = vadd.f32 %v389_v30, %v388_v29 }
 0x3d1   :  { %v391_v32 = vadd.f32 1e-30, %v390_v31 }
 0x3d3   :  { %774 = vrsqrt.f32 %v391_v32  ;;  %vm398_vm12 = vweird.f32 %v391_v32 }
 0x3d9   :  { %v775_v33 = vpop.eup %774 }
 0x3da   :  { %v393_v34 = vmul.f32 %v775_v33, %v391_v32  ;;  %vm399_vm11 = vweird.f32 %v775_v33 }
 0x3db   :  { %vm400_vm13 = vmor %vm398_vm12, %vm399_vm11 }
 0x3dc   :  { %v394_v35 = vmul.f32 %v775_v33, %v393_v34 }
 0x3de   :  { %v395_v36 = vmul.f32 0.5, %v394_v35 }
 0x3e0   :  { %v396_v37 = vsub.f32 1.5, %v395_v36 }
 0x3e2   :  { %v397_v38 = vmul.f32 %v775_v33, %v396_v37 }
 0x3e4   :  { %v401_v39 = vsel %vm400_vm13, %v775_v33, %v397_v38 }
 0x3e5   :  { %v402_v40 = vmul.f32 %v401_v39, %v376_v8 }
 0x3e7   :  { %747 = vmatpush.msk.msra.mxu3 %vm289_vm8, %v402_v40 }
 0x3e8   :  { %748 = vmatmul.msk.f32.vlgmr.msra.gmra.mxu3 %vm58_vm9, %v402_v40 }
 0x46b   :  { %v425_v42 = vpop.f32.mrf.mxu3 }
 0x46c   :  { %v428_v43 = vmul.f32 %v425_v42, %v425_v42 }
 0x46e   :  { %v429_v44 = vsel %vm380_vm10, %v428_v43, 0.0 }
 0x46f   :  { %430 = vadd.xlane.f32.xlu0 %v429_v44 }
 0x4e2   :  { %v431_v45 = vpop.xlane.xlu0 %430 }
 0x4e3   :  { %v432_v46 = vsel %vm289_vm8, %v431_v45, 0.0 }
 0x4e4   :  { %v433_v47 = vrot.slane %v432_v46, 4 }
 0x4e6   :  { %v434_v48 = vadd.f32 %v433_v47, %v432_v46 }
 0x4e8   :  { %v435_v49 = vrot.slane %v434_v48, 2 }
 0x4ea   :  { %v436_v50 = vadd.f32 %v435_v49, %v434_v48 }
 0x4ec   :  { %v437_v51 = vrot.slane %v436_v50, 1 }
 0x4ee   :  { %v438_v52 = vadd.f32 %v437_v51, %v436_v50 }
 0x4f0   :  { %v439_v53 = vadd.f32 1e-30, %v438_v52 }
 0x4f2   :  { %776 = vrsqrt.f32 %v439_v53  ;;  %vm446_vm15 = vweird.f32 %v439_v53 }
 0x4f8   :  { %v777_v54 = vpop.eup %776 }
 0x4f9   :  { %v441_v55 = vmul.f32 %v777_v54, %v439_v53  ;;  %vm447_vm14 = vweird.f32 %v777_v54 }
 0x4fa   :  { %vm448_vm0 = vmor %vm446_vm15, %vm447_vm14 }
 0x4fb   :  { %v442_v56 = vmul.f32 %v777_v54, %v441_v55 }
 0x4fd   :  { %v443_v57 = vmul.f32 0.5, %v442_v56 }
 0x4ff   :  { %v444_v58 = vsub.f32 1.5, %v443_v57 }
 0x501   :  { %v445_v59 = vmul.f32 %v777_v54, %v444_v58 }
 0x503   :  { %v449_v60 = vsel %vm448_vm0, %v777_v54, %v445_v59 }
 0x504   :  { %v450_v61 = vmul.f32 %v449_v60, %v425_v42 }
 0x506   :  { %749 = vmatpush.msk.msrb.mxu2 %vm289_vm8, %v450_v61 }
 0x507   :  { %750 = vmatmul.msk.f32.vlgmr.msrb.gmra.mxu2 %vm58_vm9, %v450_v61 }
 0x58a   :  { %v473_v62 = vpop.f32.mrf.mxu2 }
 0x58b   :  { %v476_v63 = vmul.f32 %v473_v62, %v473_v62 }
 0x58d   :  { %v477_v0 = vsel %vm380_vm10, %v476_v63, 0.0 }
 0x58e   :  { %478 = vadd.xlane.f32.xlu1 %v477_v0 }
 0x601   :  { %v479_v1 = vpop.xlane.xlu1 %478 }
 0x602   :  { %v480_v2 = vsel %vm289_vm8, %v479_v1, 0.0  ;;  %v202_v1 = vmul.f32 %v926_v18, %v931_v20 }
 0x603   :  { %v481_v3 = vrot.slane %v480_v2, 4 }
 0x605   :  { %v482_v4 = vadd.f32 %v481_v3, %v480_v2  ;;  %v203_v2 = vsel %vm58_vm9, %v202_v1, 0.0 }
 0x607   :  { %v483_v5 = vrot.slane %v482_v4, 2 }
 0x609   :  { %v484_v6 = vadd.f32 %v483_v5, %v482_v4 }
 0x60b   :  { %v485_v9 = vrot.slane %v484_v6, 1 }
 0x60d   :  { %v486_v11 = vadd.f32 %v485_v9, %v484_v6 }
 0x60f   :  { %v487_v12 = vadd.f32 1e-30, %v486_v11 }
 0x611   :  { %778 = vrsqrt.f32 %v487_v12  ;;  %vm494_vm2 = vweird.f32 %v487_v12 }
 0x617   :  { %v779_v13 = vpop.eup %778 }
 0x618   :  { %v489_v7 = vmul.f32 %v779_v13, %v487_v12  ;;  %vm495_vm1 = vweird.f32 %v779_v13 }
 0x619   :  { %vm496_vm3 = vmor %vm494_vm2, %vm495_vm1 }
 0x61a   :  { %v490_v14 = vmul.f32 %v779_v13, %v489_v7 }
 0x61c   :  { %v491_v15 = vmul.f32 0.5, %v490_v14 }
 0x61e   :  { %v492_v16 = vsub.f32 1.5, %v491_v15 }
 0x620   :  { %v493_v17 = vmul.f32 %v779_v13, %v492_v16 }
 0x622   :  { %v497_v19 = vsel %vm496_vm3, %v779_v13, %v493_v17 }
 0x623   :  { %v498_v21 = vmul.f32 %v497_v19, %v473_v62 }
 0x625   :  { %751 = vmatpush.msk.msra.mxu1 %vm289_vm8, %v498_v21 }
 0x626   :  { %752 = vmatmul.msk.f32.vlgmr.msra.gmra.mxu1 %vm58_vm9, %v498_v21 }
 0x6a3   :  { %v521_v8 = vpop.f32.mrf.mxu1 }
 0x6a4   :  { %v524_v10 = vmul.f32 %v521_v8, %v521_v8 }
 0x6a6   :  { %v525_v23 = vsel %vm380_vm10, %v524_v10, 0.0 }
 0x6a7   :  { %526 = vadd.xlane.f32.xlu2 %v525_v23  ;;  %v43_v23 = vld [vmem:[%s997_s3] sm:$0xff]  ;;  %s852_s3 = smov [#allocation5]  }
 0x71a   :  { %v527_v24 = vpop.xlane.xlu2 %526 }
 0x71b   :  { %v528_v25 = vsel %vm289_vm8, %v527_v24, 0.0  ;;  %v44_v24 = vld [vmem:[%s998_s4] sm:$0xff]  ;;  %s724_s4 = sshll.u32 %s852_s3, 4  ;;  %s725_s4 = int_to_ptr.vmem [resolvable:$true] %s724_s4 }
 0x71c   :  { %v529_v26 = vrot.slane %v528_v25, 4 }
 0x71e   :  { %v530_v27 = vadd.f32 %v529_v26, %v528_v25  ;;  %v56_v25 = vsub.f32 %v43_v23, %v44_v24 }
 0x720   :  { %v531_v28 = vrot.slane %v530_v27, 2  ;;  %v57_v26 = vmul.f32 %v56_v25, %v56_v25 }
 0x722   :  { %v532_v29 = vadd.f32 %v531_v28, %v530_v27  ;;  %v59_v28 = vsel %vm58_vm9, %v57_v26, 0.0 }
 0x724   :  { %v533_v30 = vrot.slane %v532_v29, 1 }
 0x726   :  { %v534_v31 = vadd.f32 %v533_v30, %v532_v29  ;;  %v703_v30 = vand.u32 2147483647, %v931_v20 }
 0x728   :  { %v535_v32 = vadd.f32 1e-30, %v534_v31  ;;  %v704_v31 = vsel %vm58_vm9, %v703_v30, 0.0 }
 0x72a   :  { %780 = vrsqrt.f32 %v535_v32  ;;  %vm542_vm5 = vweird.f32 %v535_v32 }
 0x730   :  { %v781_v33 = vpop.eup %780 }
 0x731   :  { %v537_v34 = vmul.f32 %v781_v33, %v535_v32  ;;  %vm543_vm4 = vweird.f32 %v781_v33 }
 0x732   :  { %vm544_vm6 = vmor %vm542_vm5, %vm543_vm4  ;;  %vm717_vm5 = vcmask 0  }
 0x733   :  { %v538_v35 = vmul.f32 %v781_v33, %v537_v34 }
 0x735   :  { %v539_v36 = vmul.f32 0.5, %v538_v35 }
 0x737   :  { %v540_v37 = vsub.f32 1.5, %v539_v36 }
 0x739   :  { %v541_v38 = vmul.f32 %v781_v33, %v540_v37 }
 0x73b   :  { %v545_v39 = vsel %vm544_vm6, %v781_v33, %v541_v38 }
 0x73c   :  { %v546_v40 = vmul.f32 %v545_v39, %v521_v8 }
 0x73e   :  { %753 = vmatpush.msk.msrb.mxu3 %vm289_vm8, %v546_v40 }
 0x73f   :  { %754 = vmatmul.msk.f32.vlgmr.msrb.gmra.mxu3 %vm58_vm9, %v546_v40  ;;  %v313_v40 = vmul.f32 %v951_v41, %v931_v20 }
 0x7c2   :  { %v569_v42 = vpop.f32.mrf.mxu3 }
 0x7c3   :  { %v572_v43 = vmul.f32 %v569_v42, %v569_v42 }
 0x7c5   :  { %v573_v44 = vsel %vm380_vm10, %v572_v43, 0.0 }
 0x7c6   :  { %574 = vadd.xlane.f32.xlu0 %v573_v44 }
 0x839   :  { %v575_v45 = vpop.xlane.xlu0 %574 }
 0x83a   :  { %v576_v46 = vsel %vm289_vm8, %v575_v45, 0.0 }
 0x83b   :  { %v577_v47 = vrot.slane %v576_v46, 4 }
 0x83d   :  { %v578_v48 = vadd.f32 %v577_v47, %v576_v46 }
 0x83f   :  { %v579_v49 = vrot.slane %v578_v48, 2 }
 0x841   :  { %v580_v50 = vadd.f32 %v579_v49, %v578_v48 }
 0x843   :  { %v581_v51 = vrot.slane %v580_v50, 1 }
 0x845   :  { %v582_v52 = vadd.f32 %v581_v51, %v580_v50  ;;  %v850_v50 = vmov 4.0  }
 0x847   :  { %v583_v53 = vadd.f32 1e-30, %v582_v52 }
 0x849   :  { %782 = vrsqrt.f32 %v583_v53  ;;  %vm590_vm11 = vweird.f32 %v583_v53 }
 0x84f   :  { %v783_v54 = vpop.eup %782 }
 0x850   :  { %v585_v55 = vmul.f32 %v783_v54, %v583_v53  ;;  %vm591_vm7 = vweird.f32 %v783_v54 }
 0x851   :  { %vm592_vm12 = vmor %vm590_vm11, %vm591_vm7 }
 0x852   :  { %v586_v56 = vmul.f32 %v783_v54, %v585_v55 }
 0x854   :  { %v587_v57 = vmul.f32 0.5, %v586_v56 }
 0x856   :  { %v588_v58 = vsub.f32 1.5, %v587_v57 }
 0x858   :  { %v589_v59 = vmul.f32 %v783_v54, %v588_v58 }
 0x85a   :  { %v593_v60 = vsel %vm592_vm12, %v783_v54, %v589_v59 }
 0x85b   :  { %v594_v61 = vmul.f32 %v593_v60, %v569_v42  ;;  %v314_v42 = vsel %vm58_vm9, %v313_v40, 0.0  ;;  %v851_v60 = vmov 8.0  }
 0x85d   :  { %755 = vmatpush.msk.msra.mxu2 %vm289_vm8, %v594_v61 }
 0x85e   :  { %756 = vmatmul.msk.f32.vlgmr.msra.gmra.mxu2 %vm58_vm9, %v594_v61 }
 0x8e1   :  { %v617_v62 = vpop.f32.mrf.mxu2 }
 0x8e2   :  { %v620_v63 = vmul.f32 %v617_v62, %v617_v62 }
 0x8e4   :  { %v621_v0 = vsel %vm380_vm10, %v620_v63, 0.0 }
 0x8e5   :  { %622 = vadd.xlane.f32.xlu1 %v621_v0 }
 0x8ed   :  { %204 = vadd.xlane.f32.xlu1 %v203_v2 }
 0x8f5   :  { %705 = vadd.xlane.f32.xlu1 %v704_v31 }
 0x958   :  { %v623_v3 = vpop.xlane.xlu1 %622 }
 0x959   :  { %v624_v4 = vsel %vm289_vm8, %v623_v3, 0.0 }
 0x95a   :  { %v625_v5 = vrot.slane %v624_v4, 4 }
 0x95c   :  { %v626_v6 = vadd.f32 %v625_v5, %v624_v4 }
 0x95e   :  { %v627_v9 = vrot.slane %v626_v6, 2 }
 0x960   :  { %v628_v11 = vadd.f32 %v627_v9, %v626_v6  ;;  %v205_v56 = vpop.xlane.xlu1 %204 }
 0x961   :  { %v206_v61 = vmul.f32 -2.0, %v205_v56 }
 0x962   :  { %v629_v12 = vrot.slane %v628_v11, 1 }
 0x963   :  { %v208_v4 = vrot.slane %v206_v61, 4 }
 0x964   :  { %v630_v13 = vadd.f32 %v629_v12, %v628_v11 }
 0x966   :  { %v631_v7 = vadd.f32 1e-30, %v630_v13 }
 0x968   :  { %784 = vrsqrt.f32 %v631_v7  ;;  %vm638_vm14 = vweird.f32 %v631_v7 }
 0x969   :  { %786 = vrcp.f32 %v850_v50 }
 0x96e   :  { %v785_v14 = vpop.eup %784 }
 0x96f   :  { %v633_v15 = vmul.f32 %v785_v14, %v631_v7  ;;  %vm639_vm13 = vweird.f32 %v785_v14  ;;  %v787_v52 = vpop.eup %786  ;;  %v209_v7 = vadd.f32 %v208_v4, %v206_v61 }
 0x970   :  { %vm640_vm15 = vmor %vm638_vm14, %vm639_vm13  ;;  %v63_v53 = vmul.f32 4.0, %v787_v52  ;;  %vm67_vm9 = vweird.f32 %v787_v52 }
 0x971   :  { %v634_v16 = vmul.f32 %v785_v14, %v633_v15  ;;  %v210_v24 = vrot.slane %v209_v7, 2 }
 0x972   :  { %v64_v54 = vsub.f32 1.0, %v63_v53 }
 0x973   :  { %v635_v17 = vmul.f32 0.5, %v634_v16 }
 0x974   :  { %v65_v55 = vmul.f32 %v787_v52, %v64_v54 }
 0x975   :  { %v636_v19 = vsub.f32 1.5, %v635_v17 }
 0x976   :  { %v66_v59 = vadd.f32 %v787_v52, %v65_v55 }
 0x977   :  { %v637_v18 = vmul.f32 %v785_v14, %v636_v19 }
 0x978   :  { %v68_v2 = vsel %vm67_vm9, %v787_v52, %v66_v59 }
 0x979   :  { %v641_v21 = vsel %vm640_vm15, %v785_v14, %v637_v18  ;;  %v706_v18 = vpop.xlane.xlu1 %705 }
 0x97a   :  { %v642_v8 = vmul.f32 %v641_v21, %v617_v62  ;;  %v708_v26 = vrot.slane %v706_v18, 4 }
 0x97c   :  { %v643_v10 = vsel %vm380_vm10, %v642_v8, 0.0 }
 0x97d   :  { %644 = vadd.xlane.f32.xlu2 %v643_v10  ;;  %v646_v27 = vrot.slane %v643_v10, 4 }
 0x97f   :  { %v647_v29 = vadd.f32 %v646_v27, %v643_v10 }
 0x981   :  { %v648_v32 = vrot.slane %v647_v29, 2 }
 0x983   :  { %v649_v33 = vadd.f32 %v648_v32, %v647_v29 }
 0x985   :  { %60 = vadd.xlane.f32.xlu2 %v59_v28  ;;  %v650_v34 = vrot.slane %v649_v33, 1 }
 0x987   :  { %v651_v37 = vadd.f32 %v650_v34, %v649_v33  ;;  %v211_v33 = vadd.f32 %v210_v24, %v209_v7  ;;  %v709_v34 = vadd.f32 %v708_v26, %v706_v18 }
 0x9f0   :  { %v645_v35 = vpop.xlane.xlu2 %644 }
 0x9f1   :  { %v652_v36 = vmul.f32 %v645_v35, %v941_v22  ;;  %v664_v43 = vmul.f32 %v645_v35, %v645_v35 }
 0x9f3   :  { %v653_v38 = vmul.f32 %v652_v36, %v651_v37  ;;  %v665_v44 = vsel %vm289_vm8, %v664_v43, 0.0 }
 0x9f4   :  { %v666_v45 = vrot.slane %v665_v44, 4 }
 0x9f5   :  { %v654_v39 = vsel %vm380_vm10, %v653_v38, 0.0  ;;  %v212_v38 = vrot.slane %v211_v33, 1 }
 0x9f6   :  { %655 = vadd.xlane.f32.xlu0 %v654_v39  ;;  %v667_v46 = vadd.f32 %v666_v45, %v665_v44  ;;  %v710_v39 = vrot.slane %v709_v34, 2 }
 0x9f7   :  { %v213_v45 = vadd.f32 %v212_v38, %v211_v33 }
 0x9f8   :  { %v668_v47 = vrot.slane %v667_v46, 2  ;;  %v61_v3 = vpop.xlane.xlu2 %60 }
 0x9f9   :  { %v69_v9 = vmul.f32 %v68_v2, %v61_v3 }
 0x9fa   :  { %v669_v48 = vadd.f32 %v668_v47, %v667_v46  ;;  %v711_v46 = vadd.f32 %v710_v39, %v709_v34 }
 0x9fb   :  { %v70_v21 = vrot.slane %v69_v9, 4 }
 0x9fc   :  { %v670_v49 = vrot.slane %v669_v48, 1  ;;  %v712_v52 = vrot.slane %v711_v46, 1 }
 0x9fd   :  { %v71_v30 = vadd.f32 %v70_v21, %v69_v9 }
 0x9fe   :  { %315 = vadd.xlane.f32.xlu0 %v314_v42  ;;  %v671_v22 = vadd.f32 %v670_v49, %v669_v48  ;;  %v713_v56 = vadd.f32 %v712_v52, %v711_v46 }
 0x9ff   :  { %v72_v36 = vrot.slane %v71_v30, 2 }
 0xa00   :  { %v673_v51 = vmax.f32 %v671_v22, 1e-30 }
 0xa01   :  { %v73_v42 = vadd.f32 %v72_v36, %v71_v30 }
 0xa02   :  { %788 = vrcp.f32 %v673_v51  ;;  %v685_v14 = vand.u32 2147483648, %v673_v51  ;;  %vm679_vm0 = vweird.f32 %v673_v51  ;;  %v683_v17 = vand.u32 2147483647, %v673_v51 }
 0xa03   :  { %790 = vrcp.f32 %v851_v60  ;;  %v74_v49 = vrot.slane %v73_v42, 1 }
 0xa04   :  { %v686_v25 = vor.u32 1.1754944e-38, %v685_v14  ;;  %vm684_vm1 = vcmp.eq.f32.partialorder %v683_v17, 8.507059e+37 }
 0xa05   :  { %v75_v54 = vadd.f32 %v74_v49, %v73_v42 }
 0xa08   :  { %v789_v20 = vpop.eup %788 }
 0xa09   :  { %v675_v41 = vmul.f32 %v789_v20, %v673_v51  ;;  %v791_v6 = vpop.eup %790  ;;  %vm680_vm10 = vweird.f32 %v789_v20 }
 0xa0a   :  { %v77_v16 = vmul.f32 8.0, %v791_v6  ;;  %vm81_vm2 = vweird.f32 %v791_v6 }
 0xa0b   :  { %v676_v57 = vsub.f32 1.0, %v675_v41 }
 0xa0c   :  { %v78_v27 = vsub.f32 1.0, %v77_v16 }
 0xa0d   :  { %v677_v0 = vmul.f32 %v789_v20, %v676_v57 }
 0xa0e   :  { %v79_v35 = vmul.f32 %v791_v6, %v78_v27 }
 0xa0f   :  { %v678_v11 = vadd.f32 %v789_v20, %v677_v0 }
 0xa10   :  { %v80_v40 = vadd.f32 %v791_v6, %v79_v35 }
 0xa12   :  { %v82_v48 = vsel %vm81_vm2, %v791_v6, %v80_v40 }
 0xa13   :  { %v214_v51 = vmul.f32 %v213_v45, %v82_v48 }
 0xa15   :  { %v325_v55 = vadd.f32 1.0, %v214_v51 }
 0xa69   :  { %v656_v58 = vpop.xlane.xlu0 %655 }
 0xa6a   :  { %v657_v62 = vsel %vm289_vm8, %v656_v58, 0.0  ;;  %vm681_vm8 = vmor %vm679_vm0, %vm680_vm10  ;;  %v83_v58 = vmul.f32 %v82_v48, %v75_v54 }
 0xa6b   :  { %v658_v63 = vrot.slane %v657_v62, 4  ;;  %v682_v10 = vsel %vm681_vm8, %v789_v20, %v678_v11 }
 0xa6c   :  { %v687_v29 = vsel %vm684_vm1, %v686_v25, %v682_v10 }
 0xa6d   :  { %v659_v1 = vadd.f32 %v658_v63, %v657_v62  ;;  %v714_v62 = vmul.f32 %v713_v56, %v82_v48 }
 0xa6f   :  { %v660_v5 = vrot.slane %v659_v1, 2  ;;  %v715_v3 = vmul.f32 0.01, %v714_v62 }
 0xa71   :  { %v661_v12 = vadd.f32 %v660_v5, %v659_v1  ;;  %v316_v13 = vpop.xlane.xlu0 %315 }
 0xa72   :  { %v318_v15 = vrot.slane %v316_v13, 4 }
 0xa73   :  { %v662_v19 = vrot.slane %v661_v12, 1 }
 0xa74   :  { %v319_v8 = vadd.f32 %v318_v15, %v316_v13 }
 0xa75   :  { %v663_v23 = vadd.f32 %v662_v19, %v661_v12 }
 0xa76   :  { %v320_v31 = vrot.slane %v319_v8, 2 }
 0xa77   :  { %v672_v28 = vmax.f32 %v663_v23, 0.0 }
 0xa78   :  { %v321_v37 = vadd.f32 %v320_v31, %v319_v8 }
 0xa79   :  { %v688_v32 = vmul.f32 %v687_v29, %v672_v28 }
 0xa7a   :  { %v322_v43 = vrot.slane %v321_v37, 1 }
 0xa7b   :  { %792 = vrsqrt.f32 %v688_v32  ;;  %vm696_vm3 = vcmp.eq.f32.partialorder %v688_v32, inf  ;;  %v699_v61 = vand.u32 2147483648, %v688_v32  ;;  %vm698_vm4 = vcmp.eq.f32.partialorder %v688_v32, 0.0 }
 0xa7c   :  { %v323_v22 = vadd.f32 %v322_v43, %v321_v37 }
 0xa7e   :  { %v324_v20 = vmul.f32 %v323_v22, %v82_v48 }
 0xa80   :  { %v326_v59 = vadd.f32 %v325_v55, %v324_v20 }
 0xa81   :  { %v793_v44 = vpop.eup %792 }
 0xa82   :  { %v690_v47 = vmul.f32 %v793_v44, %v688_v32  ;;  %v327_v1 = vadd.f32 %v326_v59, %v83_v58 }
 0xa84   :  { %v691_v50 = vmul.f32 %v793_v44, %v690_v47 }
 0xa86   :  { %v692_v53 = vmul.f32 0.5, %v691_v50 }
 0xa88   :  { %v693_v41 = vsub.f32 1.5, %v692_v53 }
 0xa8a   :  { %v694_v57 = vmul.f32 %v793_v44, %v693_v41 }
 0xa8c   :  { %v695_v60 = vmul.f32 %v694_v57, %v688_v32 }
 0xa8e   :  { %v697_v63 = vsel %vm696_vm3, %v688_v32, %v695_v60 }
 0xa8f   :  { %v700_v0 = vsel %vm698_vm4, %v699_v61, %v697_v63 }
 0xa90   :  { %v701_v2 = vmul.f32 0.1, %v700_v0 }
 0xa92   :  { %v702_v4 = vadd.f32 %v701_v2, %v327_v1 }
 0xa94   :  { %v716_v5 = vadd.f32 %v715_v3, %v702_v4 }
 0xa96   :  { %718 = vst.msk [vmem:[#allocation5] sm:$0x1] %vm717_vm5, %v716_v5 }
 0xa97   :  { %729 = dma.vmem_to_hbm [thread:$0]  %s725_s4, 16, %s727_s7, [#allocation4]  }
 0xa98   :  { %844 = dma.done.wait [#allocation4], 16  }
 0xa99   :  { %845 = vsyncadd [#allocation4], 4294967280 }
 0xa9a   :  { %734 = vsyncpa [#allocation3], 1 }
 0xa9b   :  { %735 = vsyncpa [#allocation4], 1 }

</bundles_post_ra>
